<compile_context>
chip_gen: v7x
topology: tpu7x:2x2x1
jax: 0.10.0
libtpu: 0.0.40
codegen_flags: <defaults>
</compile_context>

<pallas_src>
import functools

import jax
import jax.numpy as jnp
from jax.experimental import pallas as pl
from jax.experimental.pallas import tpu as pltpu

MIN_VALUE = -2.65   # torch.clamp_min threshold (module default)
MAX_VALUE = -3.43   # torch.clamp_max threshold (module default; clamps applied sequentially)


def conv1x1_clamp_prelu_kernel(w_ref, b_ref, a_ref, x_ref, o_ref, *,
                               min_value, max_value):
    # w_ref: (Cout, Cin) VMEM ; b_ref: (Cout, 1) VMEM ; a_ref: (1, 1) SMEM scalar
    # x_ref: (NB, Cin, T) VMEM ; o_ref: (NB, Cout, T) VMEM   (T = lane axis, mult of 128)
    x = x_ref[...]                        # (NB, Cin, T)
    w = w_ref[...]                        # (Cout, Cin)
    cin = w.shape[1]

    # 1x1 conv as a tiny-K (Cin=3) multiply-add chain on the VPU; the MXU would
    # be <1% utilized at K=3 and the kernel is HBM-bandwidth bound anyway.
    y = b_ref[...][None, :, :]            # (1, Cout, 1) -> broadcasts over NB, T
    for k in range(cin):                  # static trip count
        y = y + w[None, :, k:k + 1] * x[:, k:k + 1, :]   # -> (NB, Cout, T)

    # clamp_min then clamp_max (sequential; matches torch even when max < min)
    y = jnp.maximum(y, min_value)
    y = jnp.minimum(y, max_value)

    # PReLU with one shared parameter, read as a cheap SMEM scalar
    a = a_ref[0, 0]
    o_ref[...] = jnp.where(y >= 0, y, a * y).astype(o_ref.dtype)


def _cdiv(a, b):
    return (a + b - 1) // b


def _round_up(a, b):
    return _cdiv(a, b) * b


def _choose_tiling(N, HW, Cin, Cout, *, max_lane_tile=65536,
                   target_step_bytes=4 << 20):
    """Pick (NB, T, HW_pad, num_n, num_t): lane-dense tiles (T % 128 == 0),
    per-step DMA big enough to amortize grid overhead, >=2 grid steps when
    possible (v7x dual-TC), and bounded VMEM on every generation."""
    itemsize = 4
    hw128 = _round_up(HW, 128)
    num_t = _cdiv(hw128, max_lane_tile)
    T = _round_up(_cdiv(hw128, num_t), 128)
    HW_pad = T * num_t

    # Amortize the ~0.35 us/step overhead for small images by blocking batch.
    per_img_bytes = T * (Cin + Cout) * itemsize
    NB = 1
    if N > 1 and per_img_bytes < target_step_bytes:
        want = max(1, target_step_bytes // per_img_bytes)
        NB = max(d for d in range(1, N + 1) if N % d == 0 and d <= want)

    # v7x has 2 TensorCores: make sure there are >= 2 grid steps if possible.
    if (N // NB) * num_t < 2:
        if NB > 1:
            NB = max(d for d in range(1, N) if N % d == 0)   # largest proper divisor
        elif num_t == 1 and T >= 256:
            num_t = 2
            T = _round_up(_cdiv(hw128, num_t), 128)
            HW_pad = T * num_t

    return NB, T, HW_pad, N // NB, num_t


def model_forward(x_nchw, w_conv, b_conv, prelu_w,
                  min_value=MIN_VALUE, max_value=MAX_VALUE):
    """x_nchw: (N, Cin, H, W) float32. Returns (N, Cout, H, W) float32."""
    N, Cin, H, W = x_nchw.shape
    Cout = w_conv.shape[0]
    HW = H * W

    NB, T, HW_pad, num_n, num_t = _choose_tiling(N, HW, Cin, Cout)

    x_mat = x_nchw.reshape(N, Cin, HW).astype(jnp.float32)   # pure view, no transpose
    if HW_pad != HW:
        x_mat = jnp.pad(x_mat, ((0, 0), (0, 0), (0, HW_pad - HW)))

    w_mat = w_conv.reshape(Cout, Cin).astype(jnp.float32)
    b_mat = b_conv.reshape(Cout, 1).astype(jnp.float32)
    a_mat = prelu_w.reshape(1, 1).astype(jnp.float32)

    kernel = functools.partial(conv1x1_clamp_prelu_kernel,
                               min_value=float(min_value),
                               max_value=float(max_value))

    out = pl.pallas_call(
        kernel,
        out_shape=jax.ShapeDtypeStruct((N, Cout, HW_pad), jnp.float32),
        grid=(num_n, num_t),
        in_specs=[
            pl.BlockSpec((Cout, Cin), lambda n, t: (0, 0)),             # weights, resident
            pl.BlockSpec((Cout, 1), lambda n, t: (0, 0)),               # bias, resident
            pl.BlockSpec(memory_space=pltpu.MemorySpace.SMEM),          # PReLU alpha scalar
            pl.BlockSpec((NB, Cin, T), lambda n, t: (n, 0, t)),         # activation tile
        ],
        out_specs=pl.BlockSpec((NB, Cout, T), lambda n, t: (n, 0, t)),  # lane-dense output
        compiler_params=pltpu.CompilerParams(
            dimension_semantics=("parallel", "parallel"),
            vmem_limit_bytes=32 * 1024 * 1024),
    )(w_mat, b_mat, a_mat, x_mat)

    if HW_pad != HW:
        out = out[:, :, :HW]
    return out.reshape(N, Cout, H, W)                        # pure view, no transpose


if __name__ == "__main__":
    key = jax.random.PRNGKey(0)
    k_x, k_w, k_b = jax.random.split(key, 3)

    # small shapes consistent with the module: Conv2d(3, 8, 1)
    N, Cin, H, W = 2, 3, 16, 16
    Cout = 8

    x = jax.random.normal(k_x, (N, Cin, H, W), dtype=jnp.float32)

    # deterministic parameter init (mimics PyTorch kaiming-uniform-ish ranges)
    fan_in = Cin * 1 * 1
    bound = 1.0 / (fan_in ** 0.5)
    w_conv = jax.random.uniform(k_w, (Cout, Cin, 1, 1), jnp.float32, -bound, bound)
    b_conv = jax.random.uniform(k_b, (Cout,), jnp.float32, -bound, bound)
    prelu_w = jnp.array([0.25], dtype=jnp.float32)   # PReLU default init

    out = model_forward(x, w_conv, b_conv, prelu_w)
    jax.block_until_ready(out)

    # pure-JAX reference for correctness
    ref = jnp.einsum('oc,nchw->nohw', w_conv.reshape(Cout, Cin), x)
    ref = ref + b_conv.reshape(1, Cout, 1, 1)
    ref = jnp.maximum(ref, MIN_VALUE)
    ref = jnp.minimum(ref, MAX_VALUE)
    ref = jnp.where(ref >= 0, ref, prelu_w.reshape(1, 1, 1, 1) * ref)

    assert out.shape == (N, Cout, H, W), out.shape
    assert jnp.allclose(out, ref, atol=1e-5, rtol=1e-5), float(jnp.max(jnp.abs(out - ref)))
    print("KERNEL_OK")
</pallas_src>

<mosaic_0001>
module attributes {stable_mosaic.version = 11 : i64} {
  func.func @conv1x1_clamp_prelu_kernel(%arg0: i32, %arg1: i32, %arg2: memref<8x3xf32, #tpu.memory_space<vmem>>, %arg3: memref<8x1xf32, #tpu.memory_space<vmem>>, %arg4: memref<1x1xf32, #tpu.memory_space<smem>>, %arg5: memref<1x3x256xf32, #tpu.memory_space<vmem>>, %arg6: memref<1x8x256xf32, #tpu.memory_space<vmem>>) attributes {dimension_semantics = [#tpu.dimension_semantics<parallel>, #tpu.dimension_semantics<parallel>], iteration_bounds = array<i64: 2, 1>, scalar_prefetch = 0 : i64, scratch_operands = 0 : i64, tpu.core_type = #tpu.core_type<tc>, window_params = [{pipeline_mode = #tpu.pipeline_mode<synchronous>, transform_indices = @transform_0, window_bounds = array<i64: 8, 3>}, {pipeline_mode = #tpu.pipeline_mode<synchronous>, transform_indices = @transform_1, window_bounds = array<i64: 8, 1>}, {transform_indices = @transform_2, window_bounds = array<i64: 1, 1>}, {transform_indices = @transform_3, window_bounds = array<i64: 1, 3, 256>}, {transform_indices = @transform_4, window_bounds = array<i64: 1, 8, 256>}]} {
    %c0 = arith.constant 0 : index
    %c0_0 = arith.constant 0 : index
    %c0_1 = arith.constant 0 : index
    %0 = vector.load %arg5[%c0, %c0_0, %c0_1] : memref<1x3x256xf32, #tpu.memory_space<vmem>>, vector<1x3x256xf32>
    %c0_2 = arith.constant 0 : index
    %c0_3 = arith.constant 0 : index
    %1 = vector.load %arg2[%c0_2, %c0_3] : memref<8x3xf32, #tpu.memory_space<vmem>>, vector<8x3xf32>
    %c0_4 = arith.constant 0 : index
    %c0_5 = arith.constant 0 : index
    %2 = vector.load %arg3[%c0_4, %c0_5] : memref<8x1xf32, #tpu.memory_space<vmem>>, vector<8x1xf32>
    %3 = vector.shape_cast %2 : vector<8x1xf32> to vector<1x8x1xf32>
    %4 = vector.extract_strided_slice %1 {offsets = [0, 0], sizes = [8, 1], strides = [1, 1]} : vector<8x3xf32> to vector<8x1xf32>
    %5 = vector.shape_cast %4 : vector<8x1xf32> to vector<1x8x1xf32>
    %6 = vector.extract_strided_slice %0 {offsets = [0, 0, 0], sizes = [1, 1, 256], strides = [1, 1, 1]} : vector<1x3x256xf32> to vector<1x1x256xf32>
    %7 = vector.broadcast %5 : vector<1x8x1xf32> to vector<1x8x256xf32>
    %8 = vector.broadcast %6 : vector<1x1x256xf32> to vector<1x8x256xf32>
    %9 = arith.mulf %7, %8 : vector<1x8x256xf32>
    %10 = vector.broadcast %3 : vector<1x8x1xf32> to vector<1x8x256xf32>
    %11 = arith.addf %10, %9 : vector<1x8x256xf32>
    %12 = vector.extract_strided_slice %1 {offsets = [0, 1], sizes = [8, 1], strides = [1, 1]} : vector<8x3xf32> to vector<8x1xf32>
    %13 = vector.shape_cast %12 : vector<8x1xf32> to vector<1x8x1xf32>
    %14 = vector.extract_strided_slice %0 {offsets = [0, 1, 0], sizes = [1, 1, 256], strides = [1, 1, 1]} : vector<1x3x256xf32> to vector<1x1x256xf32>
    %15 = vector.broadcast %13 : vector<1x8x1xf32> to vector<1x8x256xf32>
    %16 = vector.broadcast %14 : vector<1x1x256xf32> to vector<1x8x256xf32>
    %17 = arith.mulf %15, %16 : vector<1x8x256xf32>
    %18 = arith.addf %11, %17 : vector<1x8x256xf32>
    %19 = vector.extract_strided_slice %1 {offsets = [0, 2], sizes = [8, 1], strides = [1, 1]} : vector<8x3xf32> to vector<8x1xf32>
    %20 = vector.shape_cast %19 : vector<8x1xf32> to vector<1x8x1xf32>
    %21 = vector.extract_strided_slice %0 {offsets = [0, 2, 0], sizes = [1, 1, 256], strides = [1, 1, 1]} : vector<1x3x256xf32> to vector<1x1x256xf32>
    %22 = vector.broadcast %20 : vector<1x8x1xf32> to vector<1x8x256xf32>
    %23 = vector.broadcast %21 : vector<1x1x256xf32> to vector<1x8x256xf32>
    %24 = arith.mulf %22, %23 : vector<1x8x256xf32>
    %25 = arith.addf %18, %24 : vector<1x8x256xf32>
    %cst = arith.constant -2.650000e+00 : f32
    %26 = vector.broadcast %cst : f32 to vector<1x8x256xf32>
    %27 = arith.maximumf %25, %26 : vector<1x8x256xf32>
    %cst_6 = arith.constant -3.430000e+00 : f32
    %28 = vector.broadcast %cst_6 : f32 to vector<1x8x256xf32>
    %29 = arith.minimumf %27, %28 : vector<1x8x256xf32>
    %c0_7 = arith.constant 0 : index
    %c0_8 = arith.constant 0 : index
    %30 = memref.load %arg4[%c0_7, %c0_8] : memref<1x1xf32, #tpu.memory_space<smem>>
    %cst_9 = arith.constant 0.000000e+00 : f32
    %31 = vector.broadcast %cst_9 : f32 to vector<1x8x256xf32>
    %32 = arith.cmpf oge, %29, %31 : vector<1x8x256xf32>
    %33 = vector.broadcast %30 : f32 to vector<1x8x256xf32>
    %34 = arith.mulf %33, %29 : vector<1x8x256xf32>
    %35 = arith.select %32, %29, %34 : vector<1x8x256xi1>, vector<1x8x256xf32>
    %c0_10 = arith.constant 0 : index
    %c0_11 = arith.constant 0 : index
    %c0_12 = arith.constant 0 : index
    %36 = vector.load %arg6[%c0_10, %c0_11, %c0_12] : memref<1x8x256xf32, #tpu.memory_space<vmem>>, vector<1x8x256xf32>
    tpu.vector_store %arg6[%c0_10, %c0_11, %c0_12], %35 {strides = array<i32>} : memref<1x8x256xf32, #tpu.memory_space<vmem>>, vector<1x8x256xf32>,
    return
  }
  func.func @transform_0(%arg0: i32, %arg1: i32) -> (i32, i32) {
    %c0_i32 = arith.constant 0 : i32
    %c0_i32_0 = arith.constant 0 : i32
    %c0_i32_1 = arith.constant 0 : i32
    return %c0_i32, %c0_i32_0 : i32, i32
  }
  func.func @transform_1(%arg0: i32, %arg1: i32) -> (i32, i32) {
    %c0_i32 = arith.constant 0 : i32
    %c0_i32_0 = arith.constant 0 : i32
    %c0_i32_1 = arith.constant 0 : i32
    return %c0_i32, %c0_i32_0 : i32, i32
  }
  func.func @transform_2(%arg0: i32, %arg1: i32) -> (i32, i32) {
    %c0_i32 = arith.constant 0 : i32
    %c0_i32_0 = arith.constant 0 : i32
    %c0_i32_1 = arith.constant 0 : i32
    return %c0_i32, %c0_i32_0 : i32, i32
  }
  func.func @transform_3(%arg0: i32, %arg1: i32) -> (i32, i32, i32) {
    %c0_i32 = arith.constant 0 : i32
    %c0_i32_0 = arith.constant 0 : i32
    return %arg0, %c0_i32, %arg1 : i32, i32, i32
  }
  func.func @transform_4(%arg0: i32, %arg1: i32) -> (i32, i32, i32) {
    %c0_i32 = arith.constant 0 : i32
    %c0_i32_0 = arith.constant 0 : i32
    return %arg0, %c0_i32, %arg1 : i32, i32, i32
  }
}

</mosaic_0001>

<bundles_post_ra>
// kernel: tpu_custom_call.1
= control target key start
LH: loop header
LB: loop body
LE: loop exit
PB: predicated region body
PF: predicated region fallthrough
CT: control target
= control target key end

     0   :  { %s734_s0 = inlined_call_operand.vmem [shape: f32[8,3], index: 0, kind: input, shape index: {}]   ;;  %s735_s1 = inlined_call_operand.vmem [shape: f32[8,1], index: 1, kind: input, shape index: {}]   ;;  %s736_s2 = inlined_call_operand.<no memory space> [shape: f32[1,1], index: 2, kind: input, shape index: {}]   ;;  %s737_s3 = inlined_call_operand.vmem [shape: f32[2,3,256], index: 3, kind: input, shape index: {}]   ;;  %s738_s4 = inlined_call_operand.hbm [shape: f32[2,8,256], index: 4, kind: output, shape index: {}]  }
   0x1   :  { %9 = sst [smem:[#allocation2]] %s736_s2 }
   0x2   :  { %10 = vsyncpa [#allocation4], 0 }
   0x3   :  { %12 = vsyncpa [#allocation4 + $0x1], 0  ;;  %s612_s17 = smov 0   ;;  %s614_s18 = smov 0  }
   0x4   :  { %s616_s19 = smov 0   ;;  %s618_s20 = smov 0  }
   0x5   :  { %s620_s21 = smov 0   ;;  %s622_s22 = smov 0  }
   0x6 LB: > { %s423_s2 = sadd.s32 4294967295, %s578_s22   ;;  %s424_s23 = sadd.s32 4294967294, %s578_s22   ;;  %s578_s22 = sphi %s622_s22, %s18_s22   ;;  %s574_s21 = sphi %s620_s21, %s745_s21   ;;  %s570_s20 = sphi %s618_s20, %s744_s20   ;;  %s566_s19 = sphi %s616_s19, %s743_s19   ;;  %s562_s18 = sphi %s614_s18, %s742_s18   ;;  %s558_s17 = sphi %s612_s17, %s741_s17  }
   0x7   : > { %s30_s24 = sadd.s32 1, %s574_s21  ;;  %s130_s25 = sadd.s32 1, %s566_s19 }
   0x8   : > { %p32_p0 = scmp.ge.s32.totalorder %s30_s24, 2  ;;  %p140_p1 = scmp.ne.s32.totalorder %s566_s19, %s562_s18 }
   0x9   : > { %p141_p2 = scmp.eq.s32.totalorder %s423_s2, 1  ;;  %p146_p3 = scmp.ne.s32.totalorder %s562_s18, %s558_s17 }
   0xa   : > { %s747_s24 = smov (%p32_p0, %s30_s24), 0  ;;  %p147_p5 = scmp.eq.s32.totalorder %s424_s23, 1 }
   0xb   : > { %p652_p4 = por %p141_p2, %p140_p1  ;;  %s125_s27 = ssub.s32 %s574_s21, %s747_s24 }
   0xc   : > { %p427_p6 = scmp.ge.s32.totalorder %s578_s22, 1  ;;  %p128_p7 = scmp.eq.s32.totalorder %s125_s27, 0 }
   0xd   : > { %p659_p8 = por %p147_p5, %p146_p3  ;;  %p187_p9 = scmp.lt.s32.totalorder %s578_s22, 3 }
   0xe   : > { %s665_s29 = scalar_select %p128_p7, %s566_s19, %s130_s25  }
   0xf   : > { %p188_p10 = pnand %p427_p6, %p187_p9 }
  0x10   : > { %v229_v0 = vld [vmem:[%s734_s0] sm:$0xff] (!%p188_p10)  ;;  %v580_v1 = vmov (!%p188_p10), 0   ;;  %v581_v2 = vmov (!%p188_p10), 1   ;;  %v582_v4 = vmov (!%p188_p10), 2   ;;  %p218_p11 = scmp.lt.s32.totalorder (!%p188_p10), %s570_s20, 1  ;;  %v237_v5 = vlaneseq (!%p188_p10)  ;;  %s320_s13 = sld [smem:[#allocation2]] (!%p188_p10) }
  0x11   : > { %191 = sbr.rel (%p188_p10) target bundleno = 177 (0xb1), region = 36  ;;  %496 = vset.pattern.permute.xlu0 (!%p188_p10), %v580_v1  ;;  %497 = vset.pattern.permute.xlu1 (!%p188_p10), %v581_v2  ;;  %v230_v3 = vld [vmem:[%s735_s1] sm:$0xff] (!%p188_p10)  ;;  %s214_s14 = sand.u32 (!%p188_p10), 1, %s562_s18  }
  0x12   : > { %233 = vperm.xlu0 (!%p188_p10), %496, %v229_v0   ;;  %265 = vperm.xlu1 (!%p188_p10), %497, %v229_v0   ;;  %v238_v6 = vshrl.u32 (!%p188_p10), %v237_v5, 7  ;;  %s428_s15 = sshll.u32 (!%p188_p10), %s214_s14, 4  ;;  %s437_s16 = sshll.u32 (!%p188_p10), %s570_s20, 8 }
  0x13   : > { %s216_s2 = scalar_lea.vmem (!%p188_p10), [#allocation3], %s428_s15  ;;  %s685_s30 = scalar_lea.hbm (!%p188_p10), %s738_s4, %s437_s16 }
  0x14   : > { %v239_v7 = vsub.s32 (!%p188_p10), 0, %v238_v6  ;;  %v243_v8 = vsub.s32 (!%p188_p10), 4, %v238_v6  ;;  %v270_v10 = vsub.s32 (!%p188_p10), 1, %v238_v6  ;;  %v274_v11 = vsub.s32 (!%p188_p10), 5, %v238_v6  ;;  %s347_s23 = sshll.u32 (!%p188_p10), %s216_s2, 4  ;;  %s583_s6 = smov (!%p188_p10), [#allocation3]   ;;  %s687_s23 = int_to_ptr.vmem [resolvable:$true] %s347_s23 }
  0x15   : > { %v296_v12 = vsub.s32 (!%p188_p10), 2, %v238_v6  ;;  %v300_v13 = vsub.s32 (!%p188_p10), 6, %v238_v6  ;;  %s500_s5 = scalar_lea.vmem (!%p188_p10), %s687_s23, 256  ;;  %s504_s7 = sshll.u32 (!%p188_p10), %s583_s6, 4  ;;  %s505_s7 = int_to_ptr.vmem [resolvable:$false] %s504_s7 }
  0x16   : > { %259 = vperm.xlu0 (!%p188_p10), %496, %v230_v3   ;;  %498 = vset.pattern.permute.xlu1 (!%p188_p10), %v582_v4  ;;  %v323_v44 = vstv (!%p188_p10), %s320_s13  ;;  %p501_p12 = scmp.ne.s32.totalorder (!%p188_p10), %s687_s23, %s500_s5  ;;  %p507_p1 = scmp.lt.s32.totalorder (!%p188_p10), %s687_s23, %s505_s7 }
  0x17   : > { %291 = vperm.xlu1 (!%p188_p10), %498, %v229_v0  }
  0x18   : > { %s219_s8 = scalar_select %p218_p11, %s570_s20, 1 }
  0x19   : > { %s331_s20 = scalar_lea.sflag [#allocation4], %s214_s14  ;;  %p502_p13 = pnand %p501_p12, %p652_p4 }
  0x1a   : > { %499 = vset.pattern.permute.xlu0 %v582_v4  ;;  %s436_s9 = sshll.u32 %s219_s8, 3  ;;  %s506_s8 = scalar_lea.vmem %s505_s7, 512 }
  0x1b   : > { %s225_s12 = scalar_lea.vmem %s737_s3, %s436_s9  ;;  %p503_p0 = pneg %p502_p13 }
  0x1c   : > { %v228_v9 = vld [vmem:[%s225_s12] sm:$0x77]  ;;  %p508_p2 = scmp.lt.s32.totalorder %s506_s8, %s500_s5 }
  0x1d   : > { %v240_v14 = vrot.slane %v228_v9, %v239_v7  ;;  %v244_v15 = vrot.slane %v228_v9, %v243_v8  ;;  %v271_v16 = vrot.slane %v228_v9, %v270_v10  ;;  %v275_v17 = vrot.slane %v228_v9, %v274_v11 }
  0x1e   : > { %v297_v18 = vrot.slane %v228_v9, %v296_v12  ;;  %v301_v19 = vrot.slane %v228_v9, %v300_v13  ;;  %p509_p3 = por %p508_p2, %p507_p1 }
  0x1f   : > { %v250_v20 = vrot.slane %v240_v14, %v239_v7  ;;  %v254_v21 = vrot.slane %v244_v15, %v239_v7  ;;  %v281_v24 = vrot.slane %v271_v16, %v270_v10  ;;  %v285_v25 = vrot.slane %v275_v17, %v270_v10 }
  0x20   : > { %v307_v26 = vrot.slane %v297_v18, %v296_v12  ;;  %v311_v27 = vrot.slane %v301_v19, %v296_v12  ;;  %p510_p5 = pnand %p509_p3, %p503_p0 }
  0x91   : > { %v234_v22 = vpop.permute.xlu0 %233  ;;  %v266_v23 = vpop.permute.xlu1 %265 }
  0x92   : > { %v255_v28 = vmul.f32 %v250_v20, %v234_v22  ;;  %v256_v29 = vmul.f32 %v254_v21, %v234_v22  ;;  %v286_v31 = vmul.f32 %v281_v24, %v266_v23  ;;  %v287_v32 = vmul.f32 %v285_v25, %v266_v23 }
  0x95   : > { %v260_v30 = vpop.permute.xlu0 %259 }
  0x96   : > { %v262_v33 = vadd.f32 %v260_v30, %v255_v28  ;;  %v263_v34 = vadd.f32 %v260_v30, %v256_v29  ;;  %v292_v35 = vpop.permute.xlu1 %291 }
  0x97   : > { %v312_v36 = vmul.f32 %v307_v26, %v292_v35  ;;  %v313_v37 = vmul.f32 %v311_v27, %v292_v35 }
  0x98   : > { %v288_v38 = vadd.f32 %v286_v31, %v262_v33  ;;  %v289_v39 = vadd.f32 %v287_v32, %v263_v34 }
  0x9a   : > { %v314_v40 = vadd.f32 %v312_v36, %v288_v38  ;;  %v315_v41 = vadd.f32 %v313_v37, %v289_v39 }
  0x9c   : > { %v316_v42 = vmax.f32 %v314_v40, -2.65  ;;  %v317_v43 = vmax.f32 %v315_v41, -2.65 }
  0x9e   : > { %v318_v45 = vmin.f32 %v316_v42, -3.43  ;;  %v319_v46 = vmin.f32 %v317_v43, -3.43 }
  0xa0   : > { %vm321_vm0 = vcmp.ge.f32.partialorder %v318_v45, 0.0  ;;  %vm322_vm1 = vcmp.ge.f32.partialorder %v319_v46, 0.0  ;;  %v324_v47 = vmul.f32 %v323_v44, %v318_v45  ;;  %v325_v48 = vmul.f32 %v323_v44, %v319_v46 }
  0xa2   : > { %v326_v49 = vsel %vm321_vm0, %v318_v45, %v324_v47  ;;  %v327_v50 = vsel %vm322_vm1, %v319_v46, %v325_v48 }
  0xa3   : > { %328 = vst [vmem:[%s216_s2] sm:$0xff] %v326_v49  ;;  %329 = vst [vmem:[%s216_s2 + $0x8] sm:$0xff] %v327_v50 }
  0xa4   : > { %513 = shalt.err (!%p510_p5)
}
  0xa5   : > { %s514_s9 = scalar_lea.hbm %s685_s30, 256  ;;  %s518_s12 = scalar_lea.hbm %s738_s4, 512 }
  0xa6   : > { %p515_p6 = scmp.ne.s32.totalorder %s685_s30, %s514_s9  ;;  %p519_p10 = scmp.lt.u32.totalorder %s685_s30, %s738_s4 }
  0xa7   : > { %p520_p11 = scmp.lt.u32.totalorder %s518_s12, %s514_s9  ;;  %p522_p13 = scmp.lt.u32.totalorder %s514_s9, %s685_s30 }
  0xa8   : > { %p516_p7 = pnand %p515_p6, %p652_p4 }
  0xa9   : > { %p521_p12 = por %p520_p11, %p519_p10 }
  0xaa   : > { %p517_p9 = pneg %p516_p7 }
  0xab   : > { %p523_p0 = por %p522_p13, %p521_p12 }
  0xad   : > { %p524_p1 = pnand %p523_p0, %p517_p9 }
  0xaf   : > { %527 = shalt.err (!%p524_p1)
}
  0xb0   : > { %438 = dma.vmem_to_hbm [thread:$0]  (%p652_p4), %s687_s23, 256, %s685_s30, %s331_s20  }
  0xb1 PF: > { %p444_p2 = scmp.ge.s32.totalorder %s578_s22, 2  ;;  %s359_s15 = sand.u32 1, %s558_s17  }
  0xb2   : > { %s360_s16 = scalar_lea.sflag [#allocation4], %s359_s15 }
  0xb3   : > { %p441_p3 = pnand %p444_p2, %p659_p8 }
  0xb5   : > { %553 = dma.done.wait (!%p441_p3), %s360_s16, 256  }
  0xb6   : > { %555 = vsyncadd (!%p441_p3), %s360_s16, 4294967040  ;;  %s18_s22 = sadd.s32 1, %s578_s22   ;;  %s741_s17 = smov %s562_s18 }
  0xb7   : > { %p15_p5 = scmp.ge.s32.totalorder %s18_s22, 4   ;;  %s742_s18 = smov %s566_s19 }
  0xb8   : > { %s743_s19 = smov %s665_s29  ;;  %s744_s20 = smov %s574_s21 }
  0xb9   : > { %s745_s21 = smov %s747_s24  ;;  %17 = sbr.rel (!%p15_p5) target bundleno = 6 (0x6), region = 71 }
  0xc0   :  { %365 = vsyncpa [#allocation4], 1 }
  0xc1   :  { %367 = vsyncpa [#allocation4 + $0x1], 1 }

</bundles_post_ra>
